<compile_context>
chip_gen: v5e
topology: v5e:2x2
jax: 0.10.0
libtpu: 0.0.40
codegen_flags: <defaults>
</compile_context>

<pallas_src>
import functools

import jax
import jax.numpy as jnp
from jax import lax
from jax.experimental import pallas as pl
from jax.experimental.pallas import tpu as pltpu


def _ce_kernel(logits_ref, targets_ref, out_ref, acc_ref, *, tl, valid_last, ragged):
    """Grid = (N, nj).  Per batch row: accumulate per-lane NLL over spatial tiles."""
    j = pl.program_id(1)
    last = pl.num_programs(1) - 1

    @pl.when(j == 0)
    def _():
        acc_ref[...] = jnp.zeros_like(acc_ref)

    x = logits_ref[0]                      # (C, tl)  native dtype (f32 or bf16)
    t = targets_ref[0]                     # (1, tl)  int32

    # numerically-stable log-sum-exp over the class (sublane) axis.
    # max stays in the native dtype (exact); exp/sum run in f32.
    m = jnp.max(x, axis=0, keepdims=True)                                   # (1, tl)
    e = jnp.exp(x.astype(jnp.float32) - m.astype(jnp.float32))              # (C, tl) f32
    lse = jnp.log(jnp.sum(e, axis=0, keepdims=True)) + m.astype(jnp.float32)

    # gather the logit at the target class via a one-hot select (exact in any
    # dtype: only one non-zero per column).
    cls = lax.broadcasted_iota(jnp.int32, x.shape, 0)                       # (C, tl)
    tgt = jnp.sum(jnp.where(cls == t, x, jnp.zeros_like(x)),
                  axis=0, keepdims=True).astype(jnp.float32)                # (1, tl)

    nll = lse - tgt                                                         # (1, tl)

    if ragged:
        # Only the very last spatial tile can contain out-of-bounds columns
        # (Pallas pads the trailing block with undefined values); interior
        # tiles skip the mask entirely.
        @pl.when(j < last)
        def _():
            acc_ref[...] += nll

        @pl.when(j == last)
        def _():
            col = lax.broadcasted_iota(jnp.int32, (1, tl), 1)
            acc_ref[...] += jnp.where(col < valid_last, nll, 0.0)
    else:
        acc_ref[...] += nll

    @pl.when(j == last)
    def _():
        out_ref[...] = jnp.sum(acc_ref[...]).reshape(1, 1, 1)


def cross_entropy_loss(logits_nchw, targets_nhw, *, tl=None):
    """nn.CrossEntropyLoss()(logits, targets), mean reduction.

    logits_nchw: float array (N, C, H, W)   (f32 or bf16)
    targets_nhw: int array   (N, H, W)
    returns: scalar float32 loss
    """
    N, C, H, W = logits_nchw.shape
    HW = H * W

    # class-major, transpose-free views (free reshapes of contiguous NCHW / NHW)
    x = logits_nchw.reshape(N, C, HW)                       # (N, C, HW)
    t = targets_nhw.reshape(N, 1, HW).astype(jnp.int32)     # (N, 1, HW)

    itemsize = jnp.dtype(logits_nchw.dtype).itemsize
    if tl is None:
        # VMEM byte budget per grid step:
        #   2 * C * tl * itemsize   logits double-buffer
        #   2 * 8 * tl * 4          targets double-buffer ((1, tl) pads to 8 sublanes)
        #   1 * 8 * tl * 4          f32 accumulator      ((1, tl) pads to 8 sublanes)
        budget = 16 * 1024 * 1024
        denom = 2 * C * itemsize + 96
        tl = (budget // denom) // 128 * 128
    # never allocate more lanes than the (128-rounded) spatial extent
    tl = int(max(128, min(tl, pl.cdiv(HW, 128) * 128)))

    nj = pl.cdiv(HW, tl)
    ragged = (HW % tl) != 0
    valid_last = HW - (nj - 1) * tl          # valid columns in the last tile

    kernel = functools.partial(_ce_kernel, tl=tl, valid_last=valid_last,
                               ragged=ragged)

    partials = pl.pallas_call(
        kernel,
        out_shape=jax.ShapeDtypeStruct((N, 1, 1), jnp.float32),
        grid_spec=pltpu.PrefetchScalarGridSpec(
            num_scalar_prefetch=0,
            grid=(N, nj),
            in_specs=[
                # logits: lane-dense (1, C, tl) blocks of the class-major view
                pl.BlockSpec((1, C, tl), lambda n, j: (n, 0, j)),
                # targets: lane-dense (1, 1, tl) blocks
                pl.BlockSpec((1, 1, tl), lambda n, j: (n, 0, j)),
            ],
            out_specs=pl.BlockSpec((1, 1, 1), lambda n, j: (n, 0, 0)),
            scratch_shapes=[pltpu.VMEM((1, tl), jnp.float32)],
        ),
        compiler_params=pltpu.CompilerParams(
            dimension_semantics=("parallel", "arbitrary"),
            vmem_limit_bytes=32 * 1024 * 1024,
        ),
    )(x, t)

    return jnp.sum(partials) / jnp.float32(N * HW)


def _reference_loss(logits_nchw, targets_nhw):
    # pure-JAX reference of nn.CrossEntropyLoss (mean reduction)
    N, C, H, W = logits_nchw.shape
    x = jnp.transpose(logits_nchw, (0, 2, 3, 1)).reshape(-1, C).astype(jnp.float32)
    t = targets_nhw.reshape(-1)
    logp = jax.nn.log_softmax(x, axis=-1)
    nll = -jnp.take_along_axis(logp, t[:, None], axis=-1)[:, 0]
    return jnp.mean(nll)


if __name__ == "__main__":
    key = jax.random.PRNGKey(0)
    k1, k2, k3, k4 = jax.random.split(key, 4)

    # primary case: N=2, C=4, H=W=16 (HW = 256, single non-ragged tile)
    N, C, H, W = 2, 4, 16, 16
    logits = jax.random.normal(k1, (N, C, H, W), dtype=jnp.float32)
    targets = jax.random.randint(k2, (N, H, W), 0, C, dtype=jnp.int32)

    loss = jax.block_until_ready(cross_entropy_loss(logits, targets))
    ref = jax.block_until_ready(_reference_loss(logits, targets))
    assert jnp.allclose(loss, ref, rtol=1e-5, atol=1e-5), (loss, ref)

    # ragged case: HW = 300 with tl=128 -> 3 tiles, last tile only 44 valid
    # columns (exercises the no-pad / masked trailing-block path).
    N2, C2, H2, W2 = 2, 5, 15, 20
    logits2 = jax.random.normal(k3, (N2, C2, H2, W2), dtype=jnp.float32)
    targets2 = jax.random.randint(k4, (N2, H2, W2), 0, C2, dtype=jnp.int32)

    loss2 = jax.block_until_ready(cross_entropy_loss(logits2, targets2, tl=128))
    ref2 = jax.block_until_ready(_reference_loss(logits2, targets2))
    assert jnp.allclose(loss2, ref2, rtol=1e-5, atol=1e-5), (loss2, ref2)

    print("KERNEL_OK")
</pallas_src>

<mosaic_0001>
module attributes {stable_mosaic.version = 11 : i64} {
  func.func @_ce_kernel(%arg0: i32, %arg1: i32, %arg2: memref<1x4x256xf32, #tpu.memory_space<vmem>>, %arg3: memref<1x1x256xi32, #tpu.memory_space<vmem>>, %arg4: memref<1x1x1xf32, #tpu.memory_space<vmem>>, %arg5: memref<1x256xf32, #tpu.memory_space<vmem>>) attributes {dimension_semantics = [#tpu.dimension_semantics<parallel>, #tpu.dimension_semantics<arbitrary>], iteration_bounds = array<i64: 2, 1>, scalar_prefetch = 0 : i64, scratch_operands = 1 : i64, tpu.core_type = #tpu.core_type<tc>, window_params = [{transform_indices = @transform_0, window_bounds = array<i64: 1, 4, 256>}, {transform_indices = @transform_1, window_bounds = array<i64: 1, 1, 256>}, {transform_indices = @transform_2, window_bounds = array<i64: 1, 1, 1>}]} {
    %c0_i32 = arith.constant 0 : i32
    %0 = arith.cmpi eq, %arg1, %c0_i32 : i32
    %1 = arith.extui %0 : i1 to i32
    %c0_i32_0 = arith.constant 0 : i32
    %2 = arith.cmpi ne, %1, %c0_i32_0 : i32
    scf.if %2 {
      %cst_15 = arith.constant 0.000000e+00 : f32
      %30 = vector.broadcast %cst_15 : f32 to vector<1x256xf32>
      %c0_16 = arith.constant 0 : index
      %c0_17 = arith.constant 0 : index
      %31 = vector.load %arg5[%c0_16, %c0_17] : memref<1x256xf32, #tpu.memory_space<vmem>>, vector<1x256xf32>
      tpu.vector_store %arg5[%c0_16, %c0_17], %30 {strides = array<i32>} : memref<1x256xf32, #tpu.memory_space<vmem>>, vector<1x256xf32>,
    } else {
    }
    %c0 = arith.constant 0 : index
    %c0_1 = arith.constant 0 : index
    %c0_2 = arith.constant 0 : index
    %3 = vector.load %arg2[%c0, %c0_1, %c0_2] : memref<1x4x256xf32, #tpu.memory_space<vmem>>, vector<1x4x256xf32>
    %4 = vector.shape_cast %3 : vector<1x4x256xf32> to vector<4x256xf32>
    %c0_3 = arith.constant 0 : index
    %c0_4 = arith.constant 0 : index
    %c0_5 = arith.constant 0 : index
    %5 = vector.load %arg3[%c0_3, %c0_4, %c0_5] : memref<1x1x256xi32, #tpu.memory_space<vmem>>, vector<1x1x256xi32>
    %6 = vector.shape_cast %5 : vector<1x1x256xi32> to vector<1x256xi32>
    %cst = arith.constant dense<0xFF800000> : vector<256xf32>
    %7 = vector.multi_reduction <maximumf>, %4, %cst [0] : vector<4x256xf32> to vector<256xf32>
    %8 = vector.shape_cast %7 : vector<256xf32> to vector<1x256xf32>
    %9 = vector.broadcast %8 : vector<1x256xf32> to vector<4x256xf32>
    %10 = arith.subf %4, %9 : vector<4x256xf32>
    %11 = math.exp %10 : vector<4x256xf32>
    %cst_6 = arith.constant dense<0.000000e+00> : vector<256xf32>
    %12 = vector.multi_reduction <add>, %11, %cst_6 [0] : vector<4x256xf32> to vector<256xf32>
    %13 = vector.shape_cast %12 : vector<256xf32> to vector<1x256xf32>
    %14 = math.log %13 : vector<1x256xf32>
    %15 = arith.addf %14, %8 : vector<1x256xf32>
    %16 = tpu.iota {dimensions = array<i32: 0>} : vector<4x256xi32>
    %17 = vector.broadcast %6 : vector<1x256xi32> to vector<4x256xi32>
    %18 = arith.cmpi eq, %16, %17 : vector<4x256xi32>
    %cst_7 = arith.constant 0.000000e+00 : f32
    %19 = vector.broadcast %cst_7 : f32 to vector<4x256xf32>
    %20 = arith.select %18, %4, %19 : vector<4x256xi1>, vector<4x256xf32>
    %cst_8 = arith.constant dense<0.000000e+00> : vector<256xf32>
    %21 = vector.multi_reduction <add>, %20, %cst_8 [0] : vector<4x256xf32> to vector<256xf32>
    %22 = vector.shape_cast %21 : vector<256xf32> to vector<1x256xf32>
    %23 = arith.subf %15, %22 : vector<1x256xf32>
    %c0_9 = arith.constant 0 : index
    %c0_10 = arith.constant 0 : index
    %24 = vector.load %arg5[%c0_9, %c0_10] : memref<1x256xf32, #tpu.memory_space<vmem>>, vector<1x256xf32>
    %25 = arith.addf %24, %23 : vector<1x256xf32>
    %c0_11 = arith.constant 0 : index
    %c0_12 = arith.constant 0 : index
    %26 = vector.load %arg5[%c0_11, %c0_12] : memref<1x256xf32, #tpu.memory_space<vmem>>, vector<1x256xf32>
    tpu.vector_store %arg5[%c0_11, %c0_12], %25 {strides = array<i32>} : memref<1x256xf32, #tpu.memory_space<vmem>>, vector<1x256xf32>,
    %c0_i32_13 = arith.constant 0 : i32
    %27 = arith.cmpi eq, %arg1, %c0_i32_13 : i32
    %28 = arith.extui %27 : i1 to i32
    %c0_i32_14 = arith.constant 0 : i32
    %29 = arith.cmpi ne, %28, %c0_i32_14 : i32
    scf.if %29 {
      %c0_15 = arith.constant 0 : index
      %c0_16 = arith.constant 0 : index
      %30 = vector.load %arg5[%c0_15, %c0_16] : memref<1x256xf32, #tpu.memory_space<vmem>>, vector<1x256xf32>
      %31 = vector.shape_cast %30 : vector<1x256xf32> to vector<1x1x256xf32>
      %cst_17 = arith.constant dense<0.000000e+00> : vector<1xf32>
      %32 = vector.multi_reduction <add>, %31, %cst_17 [1, 2] : vector<1x1x256xf32> to vector<1xf32>
      %33 = vector.shape_cast %32 : vector<1xf32> to vector<1x1x1xf32>
      %34 = vector.extract %33[0, 0, 0] : f32 from vector<1x1x1xf32>
      %35 = vector.broadcast %34 : f32 to vector<1x1x1xf32>
      %c0_18 = arith.constant 0 : index
      %c0_19 = arith.constant 0 : index
      %c0_20 = arith.constant 0 : index
      %36 = vector.load %arg4[%c0_18, %c0_19, %c0_20] : memref<1x1x1xf32, #tpu.memory_space<vmem>>, vector<1x1x1xf32>
      tpu.vector_store %arg4[%c0_18, %c0_19, %c0_20], %35 {strides = array<i32>} : memref<1x1x1xf32, #tpu.memory_space<vmem>>, vector<1x1x1xf32>,
    } else {
    }
    return
  }
  func.func @transform_0(%arg0: i32, %arg1: i32) -> (i32, i32, i32) {
    %c0_i32 = arith.constant 0 : i32
    %c0_i32_0 = arith.constant 0 : i32
    return %arg0, %c0_i32, %arg1 : i32, i32, i32
  }
  func.func @transform_1(%arg0: i32, %arg1: i32) -> (i32, i32, i32) {
    %c0_i32 = arith.constant 0 : i32
    %c0_i32_0 = arith.constant 0 : i32
    return %arg0, %c0_i32, %arg1 : i32, i32, i32
  }
  func.func @transform_2(%arg0: i32, %arg1: i32) -> (i32, i32, i32) {
    %c0_i32 = arith.constant 0 : i32
    %c0_i32_0 = arith.constant 0 : i32
    %c0_i32_1 = arith.constant 0 : i32
    return %arg0, %c0_i32, %c0_i32_0 : i32, i32, i32
  }
}

</mosaic_0001>

<bundles_post_ra>
// kernel: tpu_custom_call.1
= control target key start
LH: loop header
LB: loop body
LE: loop exit
PB: predicated region body
PF: predicated region fallthrough
CT: control target
= control target key end

     0   :  { %7 = vsyncpa [#allocation4], 0  ;;  %s786_s0 = inlined_call_operand.hbm [shape: f32[2,4,256], index: 0, kind: input, shape index: {}]   ;;  %s787_s1 = inlined_call_operand.hbm [shape: s32[2,1,256], index: 1, kind: input, shape index: {}]   ;;  %s788_s2 = inlined_call_operand.vmem [shape: f32[2,1,1], index: 2, kind: output, shape index: {}]  }
   0x1   :  { %9 = vsyncpa [#allocation4 + $0x1], 0 }
   0x2   :  { %10 = vsyncpa [#allocation6], 0 }
   0x3   :  { %12 = vsyncpa [#allocation6 + $0x1], 0  ;;  %s664_s9 = smov 0   ;;  %s666_s10 = smov 0  }
   0x4   :  { %s668_s11 = smov 0   ;;  %s670_s12 = smov 0  }
   0x5   :  { %s672_s13 = smov 0   ;;  %s674_s14 = smov 0  }
   0x6 LB: > { %s448_s15 = sadd.s32 4294967295, %s646_s14   ;;  %s30_s16 = sadd.s32 1, %s642_s13  ;;  %s646_s14 = sphi %s674_s14, %s18_s14   ;;  %s642_s13 = sphi %s672_s13, %s798_s13   ;;  %s638_s12 = sphi %s670_s12, %s797_s12   ;;  %s634_s11 = sphi %s668_s11, %s796_s11   ;;  %s630_s10 = sphi %s666_s10, %s795_s10   ;;  %s626_s9 = sphi %s664_s9, %s794_s9  }
   0x7   : > { %p32_p0 = scmp.ge.s32.totalorder %s30_s16, 2  ;;  %s39_s17 = sadd.s32 1, %s634_s11 }
   0x8   : > { %p46_p1 = scmp.ne.s32.totalorder %s634_s11, %s630_s10  ;;  %p47_p2 = scmp.eq.s32.totalorder %s646_s14, 0 }
   0x9   : > { %s800_s16 = smov (%p32_p0, %s30_s16), 0  ;;  %p52_p4 = scmp.ne.s32.totalorder %s630_s10, %s626_s9 }
   0xa   : > { %p700_p3 = por %p47_p2, %p46_p1  ;;  %s34_s19 = ssub.s32 %s642_s13, %s800_s16 }
   0xb   : > { %p53_p5 = scmp.eq.s32.totalorder %s448_s15, 0  ;;  %p37_p6 = scmp.eq.s32.totalorder %s34_s19, 0 }
   0xc   : > { %p476_p8 = scmp.lt.s32.totalorder %s646_s14, 2  ;;  %s130_s22 = sand.u32 1, %s634_s11  }
   0xd   : > { %p707_p7 = por %p53_p5, %p52_p4  ;;  %s462_s23 = sshll.u32 %s642_s13, 3 }
   0xe   : > { %s713_s21 = scalar_select %p37_p6, %s634_s11, %s39_s17  }
   0xf   : > { %s452_s24 = sshll.u32 %s130_s22, 3  ;;  %s141_s27 = scalar_lea.hbm %s786_s0, %s462_s23 }
  0x10   : > { %s143_s28 = sshll.u32 %s141_s27, 4  ;;  %s134_s29 = scalar_lea.vmem [#allocation3], %s452_s24  ;;  %s144_s28 = int_to_ptr.hbm [resolvable:$true] %s143_s28 }
  0x11   : > { %s145_s30 = sshll.u32 %s134_s29, 4  ;;  %p722_p9 = pnand %p476_p8, %p700_p3  ;;  %s146_s30 = int_to_ptr.vmem [resolvable:$true] %s145_s30 }
  0x12   : > { %p457_p10 = scmp.ge.s32.totalorder %s646_s14, 1  ;;  %p171_p11 = scmp.lt.s32.totalorder %s646_s14, 3 }
  0x13   : > { %s455_s4 = sshll.u32 %s130_s22, 1  ;;  %s131_s5 = scalar_lea.sflag [#allocation4], %s130_s22 }
  0x14   : > { %472 = dma.hbm_to_vmem [thread:$0]  (!%p722_p9), %s144_s28, 128, %s146_s30, %s131_s5  }
  0x15   : > { %p172_p12 = pnand %p457_p10, %p171_p11  ;;  %s456_s6 = sshll.u32 %s642_s13, 1 }
  0x16   : > { %s156_s7 = scalar_lea.vmem [#allocation5], %s455_s4  ;;  %s162_s17 = scalar_lea.hbm %s787_s1, %s456_s6 }
  0x17   : > { %s166_s8 = sshll.u32 %s156_s7, 4  ;;  %s164_s18 = sshll.u32 %s162_s17, 4  ;;  %s167_s8 = int_to_ptr.vmem [resolvable:$true] %s166_s8  ;;  %s165_s18 = int_to_ptr.hbm [resolvable:$true] %s164_s18 }
  0x18   : > { %s153_s19 = scalar_lea.sflag [#allocation6], %s130_s22  ;;  %175 = sbr.rel (%p172_p12) target bundleno = 302 (0x12e), region = 28 }
  0x19   : > { %475 = dma.hbm_to_vmem [thread:$0]  (!%p722_p9), %s165_s18, 32, %s167_s8, %s153_s19  }
  0x1a   : > { %s177_s23 = sand.u32 (!%p172_p12), 1, %s630_s10  }
  0x1b   : > { %s458_s24 = sshll.u32 (!%p172_p12), %s177_s23, 3  ;;  %s178_s25 = scalar_lea.sflag (!%p172_p12), [#allocation4], %s177_s23 }
  0x1c   : > { %s181_s26 = scalar_lea.vmem (!%p172_p12), [#allocation3], %s458_s24 }
  0x1d   : > { %617 = dma.done.wait (%p707_p7), %s178_s25, 128  }
  0x1e   : > { %619 = vsyncadd (%p707_p7), %s178_s25, 4294967168  ;;  %s459_s27 = sshll.u32 %s177_s23, 1  ;;  %s188_s28 = scalar_lea.sflag [#allocation6], %s177_s23 }
  0x1f   : > { %s741_s29 = scalar_lea.vmem [#allocation5], %s459_s27 }
  0x20   : > { %621 = dma.done.wait (%p707_p7), %s188_s28, 32  }
  0x21   : > { %623 = vsyncadd (%p707_p7), %s188_s28, 4294967264  ;;  %v225_v0 = vlaneseq  ;;  %v648_v2 = vmov 0.0   ;;  %v230_v3 = vld [vmem:[%s181_s26] sm:$0xff]  ;;  %vm238_vm1 = vcmask 1043456   ;;  %v231_v25 = vld [vmem:[%s741_s29] sm:$0x3] }
  0x22   : > { %233 = vst [vmem:[#allocation1] ss:$2 sm:$0xff] %v230_v3  ;;  %v289_v33 = vperm.slane %v231_v25, 0  ;;  %v290_v34 = vperm.slane %v231_v25, 1  ;;  %vm320_vm4 = vcmask 1040384   ;;  %p218_p13 = scmp.lt.s32.totalorder %s638_s12, 1 }
  0x23   : > { %vm747_vm0 = vcmp.lt.s32.totalorder %v225_v0, 256  ;;  %v288_v30 = vshrl.u32 %v225_v0, 7  ;;  %vm351_vm5 = vcmask 0  }
  0x24   : > { %229 = vst.msk [vmem:[#allocation2] sm:$0x3] %vm747_vm0, %v648_v2  ;;  %s802_s12 = smov (!%p218_p13, %s638_s12), 1 }
  0x25   : > { %vm291_vm2 = vcmp.eq.s32.totalorder %v288_v30, %v289_v33  ;;  %vm292_vm3 = vcmp.eq.s32.totalorder %v288_v30, %v290_v34  ;;  %s220_s30 = scalar_lea.vmem %s788_s2, %s802_s12 }
  0x29   : > { %v234_v4 = vld.sshfl [vmem:[#allocation1] sm:$0xff pattern:$0x75316420]  ;;  %v235_v5 = vld.sshfl [vmem:[#allocation1 + $0x8] sm:$0xff pattern:$0x75316420] }
  0x2a   : > { %v239_v6 = vsel %vm238_vm1, %v234_v4, -inf  ;;  %v246_v7 = vsel %vm238_vm1, %v235_v5, -inf }
  0x2b   : > { %v240_v8 = vrot.slane %v239_v6, 4  ;;  %v247_v9 = vrot.slane %v246_v7, 4 }
  0x2d   : > { %v241_v10 = vmax.f32 %v239_v6, %v240_v8  ;;  %v248_v11 = vmax.f32 %v246_v7, %v247_v9  ;;  %v316_v8 = vld [vmem:[#allocation2] sm:$0x3] }
  0x2f   : > { %v242_v12 = vrot.slane %v241_v10, 2  ;;  %v249_v13 = vrot.slane %v248_v11, 2 }
  0x31   : > { %v243_v14 = vmax.f32 %v241_v10, %v242_v12  ;;  %v250_v15 = vmax.f32 %v248_v11, %v249_v13 }
  0x33   : > { %v244_v16 = vrot.slane %v243_v14, 1  ;;  %v251_v17 = vrot.slane %v250_v15, 1 }
  0x35   : > { %v245_v18 = vmax.f32 %v243_v14, %v244_v16  ;;  %v252_v19 = vmax.f32 %v250_v15, %v251_v17 }
  0x37   : > { %v255_v20 = vrot.slane %v252_v19, 4 }
  0x39   : > { %v256_v21 = vsel %vm238_vm1, %v245_v18, %v255_v20 }
  0x3a   : > { %v258_v22 = vsub.f32 %v230_v3, %v256_v21 }
  0x3c   : > { %v259_v23 = vmul.f32 1.442695, %v258_v22 }
  0x3e   : > { %526 = vpow2.f32 %v259_v23 }
  0x44   : > { %v527_v24 = vpop.eup %526 }
  0x45   : > { %262 = vst [vmem:[#allocation1] ss:$2 sm:$0xff] %v527_v24 }
  0x4c   : > { %v263_v26 = vld.sshfl [vmem:[#allocation1] sm:$0xff pattern:$0x75316420]  ;;  %v264_v27 = vld.sshfl [vmem:[#allocation1 + $0x8] sm:$0xff pattern:$0x75316420] }
  0x4d   : > { %v267_v28 = vsel %vm238_vm1, %v263_v26, 0.0  ;;  %v274_v29 = vsel %vm238_vm1, %v264_v27, 0.0  ;;  %293 = vst [vmem:[#allocation1] ss:$2 sm:$0xff] %v230_v3 }
  0x4e   : > { %v268_v31 = vrot.slane %v267_v28, 4  ;;  %v275_v32 = vrot.slane %v274_v29, 4 }
  0x50   : > { %v269_v35 = vadd.f32 %v268_v31, %v267_v28  ;;  %v276_v36 = vadd.f32 %v275_v32, %v274_v29 }
  0x52   : > { %v270_v37 = vrot.slane %v269_v35, 2  ;;  %v277_v38 = vrot.slane %v276_v36, 2 }
  0x54   : > { %v271_v39 = vadd.f32 %v270_v37, %v269_v35  ;;  %v278_v40 = vadd.f32 %v277_v38, %v276_v36  ;;  %v294_v41 = vld.sshfl [vmem:[#allocation1] sm:$0xff pattern:$0x75316420]  ;;  %v295_v42 = vld.sshfl [vmem:[#allocation1 + $0x8] sm:$0xff pattern:$0x75316420] }
  0x55   : > { %v298_v43 = vsel %vm291_vm2, %v294_v41, 0.0  ;;  %v299_v44 = vsel %vm292_vm3, %v295_v42, 0.0 }
  0x56   : > { %v272_v45 = vrot.slane %v271_v39, 1  ;;  %v279_v46 = vrot.slane %v278_v40, 1  ;;  %v300_v47 = vsel %vm238_vm1, %v298_v43, 0.0  ;;  %v307_v48 = vsel %vm238_vm1, %v299_v44, 0.0 }
  0x57   : > { %v301_v49 = vrot.slane %v300_v47, 4  ;;  %v308_v50 = vrot.slane %v307_v48, 4 }
  0x58   : > { %v273_v51 = vadd.f32 %v272_v45, %v271_v39  ;;  %v280_v52 = vadd.f32 %v279_v46, %v278_v40 }
  0x59   : > { %v302_v53 = vadd.f32 %v301_v49, %v300_v47  ;;  %v309_v54 = vadd.f32 %v308_v50, %v307_v48 }
  0x5a   : > { %528 = vlog2.f32 %v273_v51 }
  0x5b   : > { %530 = vlog2.f32 %v280_v52  ;;  %v303_v55 = vrot.slane %v302_v53, 2  ;;  %v310_v56 = vrot.slane %v309_v54, 2 }
  0x5d   : > { %v304_v57 = vadd.f32 %v303_v55, %v302_v53  ;;  %v311_v58 = vadd.f32 %v310_v56, %v309_v54 }
  0x5f   : > { %v305_v59 = vrot.slane %v304_v57, 1  ;;  %v312_v60 = vrot.slane %v311_v58, 1 }
  0x60   : > { %v529_v61 = vpop.eup %528 }
  0x61   : > { %v531_v62 = vpop.eup %530  ;;  %v282_v63 = vmul.f32 0.6931472, %v529_v61  ;;  %v306_v2 = vadd.f32 %v305_v59, %v304_v57  ;;  %v313_v3 = vadd.f32 %v312_v60, %v311_v58 }
  0x62   : > { %v284_v0 = vmul.f32 0.6931472, %v531_v62 }
  0x63   : > { %v285_v4 = vadd.f32 %v282_v63, %v245_v18 }
  0x64   : > { %v286_v5 = vadd.f32 %v284_v0, %v252_v19 }
  0x65   : > { %v314_v6 = vsub.f32 %v285_v4, %v306_v2 }
  0x66   : > { %v315_v7 = vsub.f32 %v286_v5, %v313_v3 }
  0x68   : > { %v319_v9 = vrot.slane %v315_v7, 7 }
  0x6a   : > { %v321_v10 = vsel %vm320_vm4, %v314_v6, %v319_v9 }
  0x6b   : > { %v323_v11 = vadd.f32 %v321_v10, %v316_v8 }
  0x6d   : > { %328 = vst.msk [vmem:[#allocation2] sm:$0x3] %vm747_vm0, %v323_v11 }
  0x74   : > { %v332_v12 = vld [vmem:[#allocation2] sm:$0x3] }
  0x75   : > { %v334_v13 = vperm.slane %v332_v12, 0  ;;  %v335_v14 = vperm.slane %v332_v12, 1 }
  0x77   : > { %v338_v15 = vsel %vm320_vm4, %v334_v13, 0.0  ;;  %v339_v16 = vsel %vm320_vm4, %v335_v14, 0.0 }
  0x78   : > { %v340_v17 = vadd.f32 %v339_v16, %v338_v15 }
  0x7a   : > { %341 = vadd.xlane.f32.xlu0 %v340_v17 }
  0xed   : > { %v342_v18 = vpop.xlane.xlu0 %341 }
  0xee   : > { %v343_v19 = vrot.slane %v342_v18, 4 }
  0xf0   : > { %v344_v20 = vadd.f32 %v343_v19, %v342_v18 }
  0xf2   : > { %v345_v21 = vrot.slane %v344_v20, 2 }
  0xf4   : > { %v346_v22 = vadd.f32 %v345_v21, %v344_v20 }
  0xf6   : > { %v347_v23 = vrot.slane %v346_v22, 1 }
  0xf8   : > { %v348_v24 = vadd.f32 %v347_v23, %v346_v22 }
  0xfa   : > { %463 = vpush %v348_v24 }
 0x12b   : > { %s464_s3 = spop %463 }
 0x12c   : > { %v350_v1 = vstv %s464_s3 }
 0x12d   : > { %352 = vst.msk [vmem:[%s220_s30] sm:$0x1] %vm351_vm5, %v350_v1 }
 0x12e PF: > { %s18_s14 = sadd.s32 1, %s646_s14   ;;  %s794_s9 = smov %s630_s10 }
 0x12f   : > { %p15_p0 = scmp.ge.s32.totalorder %s18_s14, 4   ;;  %s795_s10 = smov %s634_s11 }
 0x130   : > { %s796_s11 = smov %s713_s21  ;;  %s797_s12 = smov %s642_s13 }
 0x131   : > { %s798_s13 = smov %s800_s16  ;;  %17 = sbr.rel (!%p15_p0) target bundleno = 6 (0x6), region = 89 }
 0x136   :  { %370 = vsyncpa [#allocation4], 1 }
 0x137   :  { %372 = vsyncpa [#allocation4 + $0x1], 1 }
 0x138   :  { %373 = vsyncpa [#allocation6], 1 }
 0x139   :  { %375 = vsyncpa [#allocation6 + $0x1], 1 }

</bundles_post_ra>
